<compile_context>
chip_gen: v5e
topology: v5e:2x2
jax: 0.10.0
libtpu: 0.0.40
codegen_flags: <defaults>
</compile_context>

<pallas_src>
import functools

import jax
import jax.numpy as jnp
from jax.experimental import pallas as pl
from jax.experimental.pallas import tpu as pltpu

CHANNELS = 128          # channel_num in GTA_C
OUT_F = 10              # final logits
OUT_PAD = 128           # lane-padded width of w2/b2 (matmul stays 128-wide on MXU)


def _round_up(n, m):
    return ((n + m - 1) // m) * m


def _gta_c_kernel(x_ref, w1_ref, b1_ref, w2_ref, b2_ref, o_ref):
    # Layer 1: (tb, 128) @ (128, 128) + (1, 128), ReLU
    h = jnp.dot(x_ref[...], w1_ref[...], preferred_element_type=jnp.float32)
    h = jnp.maximum(h + b1_ref[...], 0.0)
    # Layer 2: (tb, 128) @ (128, 128) + (1, 128); padded lanes 10..127 are exactly 0.
    logits = jnp.dot(h, w2_ref[...], preferred_element_type=jnp.float32) + b2_ref[...]
    # Static slice -> simple masked store; HBM-side writeback is the true 10-wide row.
    o_ref[...] = logits[:, :OUT_F].astype(o_ref.dtype)


@functools.partial(jax.jit, static_argnames=("tb",))
def _forward(x, w1, b1, w2p, b2p, *, tb):
    """x: (B, 128) float32. Returns (B, OUT_F) logits."""
    B = x.shape[0]
    full = lambda i: (0, 0)  # weights / biases: whole-array blocks, VMEM-resident

    return pl.pallas_call(
        _gta_c_kernel,
        out_shape=jax.ShapeDtypeStruct((B, OUT_F), jnp.float32),
        grid_spec=pl.GridSpec(
            grid=(pl.cdiv(B, tb),),
            in_specs=[
                pl.BlockSpec((tb, CHANNELS), lambda i: (i, 0)),    # x tile
                pl.BlockSpec((CHANNELS, CHANNELS), full),          # w1
                pl.BlockSpec((1, CHANNELS), full),                 # b1
                pl.BlockSpec((CHANNELS, OUT_PAD), full),           # w2 (lane-padded)
                pl.BlockSpec((1, OUT_PAD), full),                  # b2 (lane-padded)
            ],
            # Block last dim == full array last dim (10): legal, contiguous HBM rows.
            out_specs=pl.BlockSpec((tb, OUT_F), lambda i: (i, 0)),
        ),
        compiler_params=pltpu.CompilerParams(
            dimension_semantics=("parallel",),
        ),
    )(x, w1, b1, w2p, b2p)


def gta_c_forward(x, params, *, tb_max=1024):
    """x: (B, 128) float32. Returns (B, 10) logits, matching GTA_C.forward."""
    B = x.shape[0]
    # Batch tile: sublane-aligned (multiple of 8), capped at tb_max so large batches
    # pipeline across several grid steps.
    tb = min(tb_max, _round_up(B, 8))
    # v7x: make sure medium/large batches produce >= 2 grid steps so the parallel
    # axis can be split across the two TensorCores.
    if B > 512 and -(-B // tb) < 2:
        tb = _round_up(-(-B // 2), 8)
    return _forward(x, params["w1"], params["b1"], params["w2p"], params["b2p"], tb=tb)


def init_params(key):
    """Mirror GTA_C.initialize_weights: N(0, 0.1) weights, zero biases.

    Weights are stored (in_features, out_features) so the kernel does x @ W + b.
    Padded w2p/b2p are built once here (hoisted out of the forward path); the extra
    lanes are zero so padded logit columns are exactly zero and never stored.
    """
    k1, k2 = jax.random.split(key, 2)
    w1 = 0.1 * jax.random.normal(k1, (CHANNELS, CHANNELS), jnp.float32)
    b1 = jnp.zeros((1, CHANNELS), jnp.float32)
    w2 = 0.1 * jax.random.normal(k2, (CHANNELS, OUT_F), jnp.float32)
    b2 = jnp.zeros((1, OUT_F), jnp.float32)

    w2p = jnp.zeros((CHANNELS, OUT_PAD), jnp.float32).at[:, :OUT_F].set(w2)
    b2p = jnp.zeros((1, OUT_PAD), jnp.float32).at[:, :OUT_F].set(b2)
    return dict(w1=w1, b1=b1, w2=w2, b2=b2, w2p=w2p, b2p=b2p)


def _reference(x, p):
    h = jnp.maximum(x @ p["w1"] + p["b1"], 0.0)
    return h @ p["w2"] + p["b2"]


if __name__ == "__main__":
    key = jax.random.PRNGKey(0)
    kp, kx = jax.random.split(key)
    params = init_params(kp)

    # Ragged batch: exercises the cdiv grid + masked partial block (no jnp.pad path).
    B = 10
    x = jax.random.normal(kx, (B, CHANNELS), jnp.float32)
    out = jax.block_until_ready(gta_c_forward(x, params))
    ref = _reference(x, params)
    assert out.shape == (B, OUT_F)
    assert jnp.allclose(out, ref, atol=1e-4, rtol=1e-4)

    # Multi-step grid path (grid > 1) with a small forced tile.
    B2 = 24
    x2 = jax.random.normal(jax.random.PRNGKey(1), (B2, CHANNELS), jnp.float32)
    out2 = jax.block_until_ready(gta_c_forward(x2, params, tb_max=8))
    ref2 = _reference(x2, params)
    assert out2.shape == (B2, OUT_F)
    assert jnp.allclose(out2, ref2, atol=1e-4, rtol=1e-4)

    print("KERNEL_OK")
</pallas_src>

<mosaic_0001>
module attributes {stable_mosaic.version = 11 : i64} {
  func.func @_gta_c_kernel(%arg0: i32, %arg1: memref<16x128xf32, #tpu.memory_space<vmem>>, %arg2: memref<128x128xf32, #tpu.memory_space<vmem>>, %arg3: memref<1x128xf32, #tpu.memory_space<vmem>>, %arg4: memref<128x128xf32, #tpu.memory_space<vmem>>, %arg5: memref<1x128xf32, #tpu.memory_space<vmem>>, %arg6: memref<16x10xf32, #tpu.memory_space<vmem>>) attributes {dimension_semantics = [#tpu.dimension_semantics<parallel>], iteration_bounds = array<i64: 1>, scalar_prefetch = 0 : i64, scratch_operands = 0 : i64, tpu.core_type = #tpu.core_type<tc>, window_params = [{transform_indices = @transform_0, window_bounds = array<i64: 16, 128>}, {pipeline_mode = #tpu.pipeline_mode<synchronous>, transform_indices = @transform_1, window_bounds = array<i64: 128, 128>}, {pipeline_mode = #tpu.pipeline_mode<synchronous>, transform_indices = @transform_2, window_bounds = array<i64: 1, 128>}, {pipeline_mode = #tpu.pipeline_mode<synchronous>, transform_indices = @transform_3, window_bounds = array<i64: 128, 128>}, {pipeline_mode = #tpu.pipeline_mode<synchronous>, transform_indices = @transform_4, window_bounds = array<i64: 1, 128>}, {transform_indices = @transform_5, window_bounds = array<i64: 16, 10>}]} {
    %c0 = arith.constant 0 : index
    %c0_0 = arith.constant 0 : index
    %0 = vector.load %arg1[%c0, %c0_0] : memref<16x128xf32, #tpu.memory_space<vmem>>, vector<16x128xf32>
    %c0_1 = arith.constant 0 : index
    %c0_2 = arith.constant 0 : index
    %1 = vector.load %arg2[%c0_1, %c0_2] : memref<128x128xf32, #tpu.memory_space<vmem>>, vector<128x128xf32>
    %cst = arith.constant dense<0.000000e+00> : vector<16x128xf32>
    %2 = tpu.matmul %0, %1, %cst {dimension_numbers = #tpu.dot_dimension_numbers<[1], [0], [0], [1], [0, 0, 1, 1], [], []>} : vector<16x128xf32>, vector<128x128xf32>, vector<16x128xf32> -> vector<16x128xf32>
    %c0_3 = arith.constant 0 : index
    %c0_4 = arith.constant 0 : index
    %3 = vector.load %arg3[%c0_3, %c0_4] : memref<1x128xf32, #tpu.memory_space<vmem>>, vector<1x128xf32>
    %4 = vector.broadcast %3 : vector<1x128xf32> to vector<16x128xf32>
    %5 = arith.addf %2, %4 : vector<16x128xf32>
    %cst_5 = arith.constant 0.000000e+00 : f32
    %6 = vector.broadcast %cst_5 : f32 to vector<16x128xf32>
    %7 = arith.maximumf %5, %6 : vector<16x128xf32>
    %c0_6 = arith.constant 0 : index
    %c0_7 = arith.constant 0 : index
    %8 = vector.load %arg4[%c0_6, %c0_7] : memref<128x128xf32, #tpu.memory_space<vmem>>, vector<128x128xf32>
    %cst_8 = arith.constant dense<0.000000e+00> : vector<16x128xf32>
    %9 = tpu.matmul %7, %8, %cst_8 {dimension_numbers = #tpu.dot_dimension_numbers<[1], [0], [0], [1], [0, 0, 1, 1], [], []>} : vector<16x128xf32>, vector<128x128xf32>, vector<16x128xf32> -> vector<16x128xf32>
    %c0_9 = arith.constant 0 : index
    %c0_10 = arith.constant 0 : index
    %10 = vector.load %arg5[%c0_9, %c0_10] : memref<1x128xf32, #tpu.memory_space<vmem>>, vector<1x128xf32>
    %11 = vector.broadcast %10 : vector<1x128xf32> to vector<16x128xf32>
    %12 = arith.addf %9, %11 : vector<16x128xf32>
    %13 = vector.extract_strided_slice %12 {offsets = [0, 0], sizes = [16, 10], strides = [1, 1]} : vector<16x128xf32> to vector<16x10xf32>
    %c0_11 = arith.constant 0 : index
    %c0_12 = arith.constant 0 : index
    %14 = vector.load %arg6[%c0_11, %c0_12] : memref<16x10xf32, #tpu.memory_space<vmem>>, vector<16x10xf32>
    tpu.vector_store %arg6[%c0_11, %c0_12], %13 {strides = array<i32>} : memref<16x10xf32, #tpu.memory_space<vmem>>, vector<16x10xf32>,
    return
  }
  func.func @transform_0(%arg0: i32) -> (i32, i32) {
    %c0_i32 = arith.constant 0 : i32
    %c0_i32_0 = arith.constant 0 : i32
    return %arg0, %c0_i32 : i32, i32
  }
  func.func @transform_1(%arg0: i32) -> (i32, i32) {
    %c0_i32 = arith.constant 0 : i32
    %c0_i32_0 = arith.constant 0 : i32
    %c0_i32_1 = arith.constant 0 : i32
    return %c0_i32, %c0_i32_0 : i32, i32
  }
  func.func @transform_2(%arg0: i32) -> (i32, i32) {
    %c0_i32 = arith.constant 0 : i32
    %c0_i32_0 = arith.constant 0 : i32
    %c0_i32_1 = arith.constant 0 : i32
    return %c0_i32, %c0_i32_0 : i32, i32
  }
  func.func @transform_3(%arg0: i32) -> (i32, i32) {
    %c0_i32 = arith.constant 0 : i32
    %c0_i32_0 = arith.constant 0 : i32
    %c0_i32_1 = arith.constant 0 : i32
    return %c0_i32, %c0_i32_0 : i32, i32
  }
  func.func @transform_4(%arg0: i32) -> (i32, i32) {
    %c0_i32 = arith.constant 0 : i32
    %c0_i32_0 = arith.constant 0 : i32
    %c0_i32_1 = arith.constant 0 : i32
    return %c0_i32, %c0_i32_0 : i32, i32
  }
  func.func @transform_5(%arg0: i32) -> (i32, i32) {
    %c0_i32 = arith.constant 0 : i32
    %c0_i32_0 = arith.constant 0 : i32
    return %arg0, %c0_i32 : i32, i32
  }
}

</mosaic_0001>

<bundles_post_ra>
// kernel: _forward.1
= control target key start
LH: loop header
LB: loop body
LE: loop exit
PB: predicated region body
PF: predicated region fallthrough
CT: control target
= control target key end

     0   :  { %10 = vsyncpa [#allocation3], 0  ;;  %s389_s0 = inlined_call_operand.hbm [shape: f32[10,128], index: 0, kind: input, shape index: {}]   ;;  %s390_s1 = inlined_call_operand.hbm [shape: f32[128,128], index: 1, kind: input, shape index: {}]   ;;  %s391_s2 = inlined_call_operand.vmem [shape: f32[1,128], index: 2, kind: input, shape index: {}]   ;;  %s392_s3 = inlined_call_operand.hbm [shape: f32[128,128], index: 3, kind: input, shape index: {}]   ;;  %s393_s4 = inlined_call_operand.vmem [shape: f32[1,128], index: 4, kind: input, shape index: {}]   ;;  %s394_s5 = inlined_call_operand.hbm [shape: f32[10,10], index: 5, kind: output, shape index: {}]  }
   0x1   :  { %11 = vsyncpa [#allocation6], 0 }
   0x2   :  { %12 = vsyncpa [#allocation4], 0  ;;  %s30_s20 = sshll.u32 %s390_s1, 4  ;;  %s323_s21 = smov [#allocation5]   ;;  %s31_s20 = int_to_ptr.hbm [resolvable:$true] %s30_s20 }
   0x3   :  { %s32_s22 = sshll.u32 %s323_s21, 4  ;;  %s17_s25 = sshll.u32 %s389_s0, 4  ;;  %s33_s22 = int_to_ptr.vmem [resolvable:$true] %s32_s22  ;;  %s18_s25 = int_to_ptr.hbm [resolvable:$true] %s17_s25 }
   0x4   :  { %s324_s26 = smov 128   ;;  %s325_s27 = smov 8  }
   0x5   :  { %38 = dma.hbm_to_vmem [thread:$0]  %s31_s20, 2048, %s33_s22, [#allocation6], %s324_s26, %s324_s26, %s325_s27  }
   0x6   :  { %s326_s28 = smov [#allocation2]   ;;  %s45_s1 = sshll.u32 %s392_s3, 4  ;;  %s46_s1 = int_to_ptr.hbm [resolvable:$true] %s45_s1 }
   0x7   :  { %s19_s29 = sshll.u32 %s326_s28, 4  ;;  %s327_s0 = smov [#allocation7]   ;;  %s20_s29 = int_to_ptr.vmem [resolvable:$true] %s19_s29 }
   0x8   :  { %25 = dma.hbm_to_vmem [thread:$0]  %s18_s25, 256, %s20_s29, [#allocation3], %s324_s26, %s324_s26, %s325_s27  }
   0x9   :  { %s47_s7 = sshll.u32 %s327_s0, 4  ;;  %s48_s7 = int_to_ptr.vmem [resolvable:$true] %s47_s7 }
   0xa   :  { %53 = dma.hbm_to_vmem [thread:$0]  %s46_s1, 2048, %s48_s7, [#allocation6], %s324_s26, %s324_s26, %s325_s27  }
   0xb   :  { %317 = dma.done.wait [#allocation3], 256  }
   0xc   :  { %318 = vsyncadd [#allocation3], 4294967040 }
   0xd   :  { %319 = dma.done.wait [#allocation6], 4096  }
   0xe   :  { %320 = vsyncadd [#allocation6], 4294963200  ;;  %v85_v0 = vld [vmem:[#allocation5 + $0x78] sm:$0xff]  ;;  %v84_v1 = vld [vmem:[#allocation5 + $0x70] sm:$0xff]  ;;  %vm158_vm0 = vcmask 80896   ;;  %s328_s11 = smov [#allocation8]  }
   0xf   :  { %181 = vmatpush.msra.mxu2 %v85_v0  ;;  %90 = vmatpush.msra.mxu0 %v85_v0  ;;  %v83_v2 = vld [vmem:[#allocation5 + $0x68] sm:$0xff]  ;;  %v82_v3 = vld [vmem:[#allocation5 + $0x60] sm:$0xff]  ;;  %v81_v4 = vld [vmem:[#allocation5 + $0x58] sm:$0xff]  ;;  %s165_s12 = sshll.u32 %s328_s11, 4  ;;  %s167_s14 = sshll.u32 %s394_s5, 4  ;;  %s166_s12 = int_to_ptr.vmem [resolvable:$true] %s165_s12  ;;  %s168_s14 = int_to_ptr.hbm [resolvable:$true] %s167_s14 }
  0x10   :  { %v130_v5 = vld [vmem:[#allocation7 + $0x78] sm:$0xff]  ;;  %v129_v6 = vld [vmem:[#allocation7 + $0x70] sm:$0xff]  ;;  %v128_v8 = vld [vmem:[#allocation7 + $0x68] sm:$0xff] }
  0x11   :  { %182 = vmatpush.msra.mxu2 %v84_v1  ;;  %91 = vmatpush.msra.mxu0 %v84_v1  ;;  %v80_v7 = vld [vmem:[#allocation5 + $0x50] sm:$0xff]  ;;  %v79_v9 = vld [vmem:[#allocation5 + $0x48] sm:$0xff]  ;;  %v127_v10 = vld [vmem:[#allocation7 + $0x60] sm:$0xff] }
  0x12   :  { %197 = vmatpush.msra.mxu3 %v130_v5  ;;  %135 = vmatpush.msra.mxu1 %v130_v5  ;;  %v78_v11 = vld [vmem:[#allocation5 + $0x40] sm:$0xff]  ;;  %v126_v12 = vld [vmem:[#allocation7 + $0x58] sm:$0xff]  ;;  %v125_v14 = vld [vmem:[#allocation7 + $0x50] sm:$0xff] }
  0x13   :  { %183 = vmatpush.msra.mxu2 %v83_v2  ;;  %92 = vmatpush.msra.mxu0 %v83_v2  ;;  %v77_v13 = vld [vmem:[#allocation5 + $0x38] sm:$0xff]  ;;  %v76_v15 = vld [vmem:[#allocation5 + $0x30] sm:$0xff]  ;;  %v124_v16 = vld [vmem:[#allocation7 + $0x48] sm:$0xff] }
  0x14   :  { %198 = vmatpush.msra.mxu3 %v129_v6  ;;  %136 = vmatpush.msra.mxu1 %v129_v6  ;;  %v75_v17 = vld [vmem:[#allocation5 + $0x28] sm:$0xff]  ;;  %v123_v18 = vld [vmem:[#allocation7 + $0x40] sm:$0xff]  ;;  %v122_v20 = vld [vmem:[#allocation7 + $0x38] sm:$0xff] }
  0x15   :  { %184 = vmatpush.msra.mxu2 %v82_v3  ;;  %93 = vmatpush.msra.mxu0 %v82_v3  ;;  %v74_v19 = vld [vmem:[#allocation5 + $0x20] sm:$0xff]  ;;  %v73_v21 = vld [vmem:[#allocation5 + $0x18] sm:$0xff]  ;;  %v121_v22 = vld [vmem:[#allocation7 + $0x30] sm:$0xff] }
  0x16   :  { %199 = vmatpush.msra.mxu3 %v128_v8  ;;  %137 = vmatpush.msra.mxu1 %v128_v8  ;;  %v72_v23 = vld [vmem:[#allocation5 + $0x10] sm:$0xff]  ;;  %v120_v24 = vld [vmem:[#allocation7 + $0x28] sm:$0xff]  ;;  %v119_v26 = vld [vmem:[#allocation7 + $0x20] sm:$0xff] }
  0x17   :  { %185 = vmatpush.msra.mxu2 %v81_v4  ;;  %94 = vmatpush.msra.mxu0 %v81_v4  ;;  %v71_v25 = vld [vmem:[#allocation5 + $0x8] sm:$0xff]  ;;  %v70_v27 = vld [vmem:[#allocation5] sm:$0xff]  ;;  %v69_v28 = vld [vmem:[#allocation2 + $0x8] sm:$0xff] }
  0x18   :  { %200 = vmatpush.msra.mxu3 %v127_v10  ;;  %138 = vmatpush.msra.mxu1 %v127_v10  ;;  %v68_v29 = vld [vmem:[#allocation2] sm:$0xff]  ;;  %v118_v30 = vld [vmem:[#allocation7 + $0x18] sm:$0xff]  ;;  %v116_v32 = vld [vmem:[#allocation7 + $0x8] sm:$0xff] }
  0x19   :  { %186 = vmatpush.msra.mxu2 %v80_v7  ;;  %95 = vmatpush.msra.mxu0 %v80_v7  ;;  %v117_v31 = vld [vmem:[#allocation7 + $0x10] sm:$0xff]  ;;  %v115_v33 = vld [vmem:[#allocation7] sm:$0xff] }
  0x1a   :  { %201 = vmatpush.msra.mxu3 %v126_v12  ;;  %139 = vmatpush.msra.mxu1 %v126_v12  ;;  %v219_v34 = vld [vmem:[%s391_s2] ss:$0 sm:$0xff] }
  0x1b   :  { %187 = vmatpush.msra.mxu2 %v79_v9  ;;  %96 = vmatpush.msra.mxu0 %v79_v9  ;;  %v220_v41 = vld [vmem:[%s393_s4] ss:$0 sm:$0xff] }
  0x1c   :  { %202 = vmatpush.msra.mxu3 %v125_v14  ;;  %140 = vmatpush.msra.mxu1 %v125_v14 }
  0x1d   :  { %188 = vmatpush.msra.mxu2 %v78_v11  ;;  %97 = vmatpush.msra.mxu0 %v78_v11 }
  0x1e   :  { %203 = vmatpush.msra.mxu3 %v124_v16  ;;  %141 = vmatpush.msra.mxu1 %v124_v16 }
  0x1f   :  { %189 = vmatpush.msra.mxu2 %v77_v13  ;;  %98 = vmatpush.msra.mxu0 %v77_v13 }
  0x20   :  { %204 = vmatpush.msra.mxu3 %v123_v18  ;;  %142 = vmatpush.msra.mxu1 %v123_v18 }
  0x21   :  { %190 = vmatpush.msra.mxu2 %v76_v15  ;;  %99 = vmatpush.msra.mxu0 %v76_v15 }
  0x22   :  { %205 = vmatpush.msra.mxu3 %v122_v20  ;;  %143 = vmatpush.msra.mxu1 %v122_v20 }
  0x23   :  { %191 = vmatpush.msra.mxu2 %v75_v17  ;;  %100 = vmatpush.msra.mxu0 %v75_v17 }
  0x24   :  { %206 = vmatpush.msra.mxu3 %v121_v22  ;;  %144 = vmatpush.msra.mxu1 %v121_v22 }
  0x25   :  { %192 = vmatpush.msra.mxu2 %v74_v19  ;;  %101 = vmatpush.msra.mxu0 %v74_v19 }
  0x26   :  { %207 = vmatpush.msra.mxu3 %v120_v24  ;;  %145 = vmatpush.msra.mxu1 %v120_v24 }
  0x27   :  { %193 = vmatpush.msra.mxu2 %v73_v21  ;;  %102 = vmatpush.msra.mxu0 %v73_v21 }
  0x28   :  { %208 = vmatpush.msra.mxu3 %v119_v26  ;;  %146 = vmatpush.msra.mxu1 %v119_v26 }
  0x29   :  { %194 = vmatpush.msra.mxu2 %v72_v23  ;;  %103 = vmatpush.msra.mxu0 %v72_v23 }
  0x2a   :  { %209 = vmatpush.msra.mxu3 %v118_v30  ;;  %147 = vmatpush.msra.mxu1 %v118_v30 }
  0x2b   :  { %195 = vmatpush.msra.mxu2 %v71_v25  ;;  %104 = vmatpush.msra.mxu0 %v71_v25 }
  0x2c   :  { %210 = vmatpush.msra.mxu3 %v117_v31  ;;  %148 = vmatpush.msra.mxu1 %v117_v31 }
  0x2d   :  { %196 = vmatpush.msra.mxu2 %v70_v27  ;;  %105 = vmatpush.msra.mxu0 %v70_v27 }
  0x2e   :  { %109 = vmatmul.f32.vlgmr.msra.gmra.mxu2 %v69_v28  ;;  %106 = vmatmul.f32.vlgmr.msra.gmra.mxu0 %v68_v29 }
  0x2f   :  { %211 = vmatpush.msra.mxu3 %v116_v32  ;;  %149 = vmatpush.msra.mxu1 %v116_v32 }
  0x31   :  { %212 = vmatpush.msra.mxu3 %v115_v33  ;;  %150 = vmatpush.msra.mxu1 %v115_v33 }
  0xab   :  { %v107_v35 = vpop.f32.mrf.mxu0 }
  0xac   :  { %v108_v36 = vadd.f32 %v219_v34, %v107_v35 }
  0xae   :  { %v113_v37 = vmax.f32 %v108_v36, 0.0 }
  0xb0   :  { %151 = vmatmul.f32.vlgmr.msra.gmra.mxu1 %v113_v37 }
  0xb1   :  { %v110_v38 = vpop.f32.mrf.mxu2 }
  0xb2   :  { %v111_v39 = vadd.f32 %v219_v34, %v110_v38 }
  0xb4   :  { %v114_v40 = vmax.f32 %v111_v39, 0.0 }
  0xb6   :  { %154 = vmatmul.f32.vlgmr.msra.gmra.mxu3 %v114_v40 }
 0x12d   :  { %v152_v42 = vpop.f32.mrf.mxu1 }
 0x12e   :  { %v153_v43 = vadd.f32 %v220_v41, %v152_v42 }
 0x130   :  { %159 = vst.msk [vmem:[#allocation8] sm:$0xff] %vm158_vm0, %v153_v43 }
 0x139   :  { %v155_v44 = vpop.f32.mrf.mxu3 }
 0x13a   :  { %v156_v45 = vadd.f32 %v220_v41, %v155_v44 }
 0x13c   :  { %160 = vst.msk [vmem:[#allocation8 + $0x8] sm:$0xff] %vm158_vm0, %v156_v45 }
 0x13d   :  { %173 = dma.vmem_to_hbm [thread:$0]  %s166_s12, 256, %s168_s14, [#allocation4], %s324_s26, %s324_s26, %s325_s27  }
 0x13e   :  { %321 = dma.done.wait [#allocation4], 256  }
 0x13f   :  { %322 = vsyncadd [#allocation4], 4294967040 }
 0x140   :  { %178 = vsyncpa [#allocation3], 1 }
 0x141   :  { %179 = vsyncpa [#allocation6], 1 }
 0x142   :  { %180 = vsyncpa [#allocation4], 1 }

</bundles_post_ra>
